<compile_context>
chip_gen: v5e
topology: v5e:2x2
jax: 0.10.0
libtpu: 0.0.40
codegen_flags: <defaults>
</compile_context>

<pallas_src>
import jax
import jax.numpy as jnp
from jax.experimental import pallas as pl
from jax.experimental.pallas import tpu as pltpu

_LANES = 128                       # vreg lane width
_TARGET_TILE_BYTES = 4 * 1024 * 1024   # ~4 MiB input tile (amortizes step overhead)
_MIN_GRID_STEPS = 4                # keep >=2 (ideally >=4) steps for v7x's 2 TCs
_MIN_PALLAS_ELEMS = 65536          # below this, fused XLA beats pallas_call overhead
_RAGGED_TILE_ELEMS = 65536         # (1, tile) lane-major fallback tile (N % 128 != 0)


def _round_up(a, b):
    return ((a + b - 1) // b) * b


def _sublanes(dtype):
    # Native sublane tile: 8 rows for 4-byte, 16 for 2-byte, 32 for 1-byte dtypes.
    return 8 * max(1, 4 // jnp.dtype(dtype).itemsize)


def _linear_kernel(w_ref, b_ref, x_ref, o_ref):
    # w_ref, b_ref: (1,) scalars in SMEM; x_ref / o_ref: lane-dense VMEM tiles.
    o_ref[...] = x_ref[...] * w_ref[0] + b_ref[0]


def linear_model_forward(x, weight, bias):
    """Forward of torch.nn.Linear(1, 1): y = x @ W^T + b. x: (N, 1)."""
    n, in_f = x.shape
    assert in_f == 1 and weight.shape == (1, 1) and bias.shape == (1,)

    w_scalar = weight.reshape((1,)).astype(x.dtype)
    b_scalar = bias.reshape((1,)).astype(x.dtype)

    # Tiny inputs: pallas_call launch / per-step overhead dwarfs the work.
    if n < _MIN_PALLAS_ELEMS:
        return x * w_scalar[0] + b_scalar[0]

    itemsize = jnp.dtype(x.dtype).itemsize
    cost = pl.CostEstimate(flops=2 * n, transcendentals=0,
                           bytes_accessed=2 * n * itemsize)
    cparams = pltpu.CompilerParams(
        dimension_semantics=("parallel",),      # independent tiles -> 2 TCs on v7x
        vmem_limit_bytes=32 * 1024 * 1024,      # 4 buffers x 4 MiB fits everywhere
    )
    flat = x.reshape(-1)                        # (N,1) -> (N,) is a free reshape

    if n % _LANES == 0:
        # Fast path: copy-free lane-dense (rows, 128) view, ragged row grid.
        rows = n // _LANES
        sub = _sublanes(x.dtype)
        max_rows = max(sub, (_TARGET_TILE_BYTES // (_LANES * itemsize)) // sub * sub)
        tile_rows = min(max_rows,
                        max(sub, _round_up(pl.cdiv(rows, _MIN_GRID_STEPS), sub)))
        x2d = flat.reshape(rows, _LANES)
        out2d = pl.pallas_call(
            _linear_kernel,
            out_shape=jax.ShapeDtypeStruct((rows, _LANES), x.dtype),
            grid=(pl.cdiv(rows, tile_rows),),
            in_specs=[
                pl.BlockSpec(memory_space=pltpu.SMEM),   # weight scalar
                pl.BlockSpec(memory_space=pltpu.SMEM),   # bias scalar
                pl.BlockSpec((tile_rows, _LANES), lambda i: (i, 0)),
            ],
            out_specs=pl.BlockSpec((tile_rows, _LANES), lambda i: (i, 0)),
            compiler_params=cparams,
            cost_estimate=cost,
        )(w_scalar, b_scalar, x2d)
        return out2d.reshape(n, 1)

    # Ragged path (N % 128 != 0): copy-free (1, N) lane-major view; Pallas masks
    # the partial last block, so no jnp.pad / output-slice HBM round trips.
    tile = min(_RAGGED_TILE_ELEMS,
               max(_LANES, _round_up(pl.cdiv(n, _MIN_GRID_STEPS), _LANES)))
    x2d = flat.reshape(1, n)
    out2d = pl.pallas_call(
        _linear_kernel,
        out_shape=jax.ShapeDtypeStruct((1, n), x.dtype),
        grid=(pl.cdiv(n, tile),),
        in_specs=[
            pl.BlockSpec(memory_space=pltpu.SMEM),       # weight scalar
            pl.BlockSpec(memory_space=pltpu.SMEM),       # bias scalar
            pl.BlockSpec((1, tile), lambda i: (0, i)),
        ],
        out_specs=pl.BlockSpec((1, tile), lambda i: (0, i)),
        compiler_params=cparams,
        cost_estimate=cost,
    )(w_scalar, b_scalar, x2d)
    return out2d.reshape(n, 1)


if __name__ == "__main__":
    key = jax.random.PRNGKey(0)
    k_w, k_b, k1, k2, k3 = jax.random.split(key, 5)

    # Parameters matching torch.nn.Linear(1, 1) shapes.
    weight = jax.random.uniform(k_w, (1, 1), jnp.float32, minval=-1.0, maxval=1.0)
    bias = jax.random.uniform(k_b, (1,), jnp.float32, minval=-1.0, maxval=1.0)

    def check(x):
        y = linear_model_forward(x, weight, bias)
        jax.block_until_ready(y)
        y_ref = x @ weight.T + bias
        assert y.shape == x.shape
        assert jnp.allclose(y, y_ref, atol=1e-6), "mismatch vs reference"

    # Tiny batch (what the module's forward implies) -> fused-XLA fallback.
    check(jax.random.normal(k1, (8, 1), jnp.float32))
    # Multiple-of-128 batch -> copy-free (rows, 128) Pallas path, multi-step grid.
    check(jax.random.normal(k2, (128 * 1024, 1), jnp.float32))
    # Ragged batch -> copy-free (1, N) Pallas path with a masked last block.
    check(jax.random.normal(k3, (128 * 1024 + 37, 1), jnp.float32))

    print("KERNEL_OK")
</pallas_src>

<mosaic_0001>
module attributes {stable_mosaic.version = 11 : i64} {
  func.func @_linear_kernel(%arg0: i32, %arg1: memref<1xf32, #tpu.memory_space<smem>>, %arg2: memref<1xf32, #tpu.memory_space<smem>>, %arg3: memref<256x128xf32, #tpu.memory_space<vmem>>, %arg4: memref<256x128xf32, #tpu.memory_space<vmem>>) attributes {dimension_semantics = [#tpu.dimension_semantics<parallel>], iteration_bounds = array<i64: 4>, scalar_prefetch = 0 : i64, scratch_operands = 0 : i64, tpu.core_type = #tpu.core_type<tc>, window_params = [{transform_indices = @transform_0, window_bounds = array<i64: 1>}, {transform_indices = @transform_1, window_bounds = array<i64: 1>}, {transform_indices = @transform_2, window_bounds = array<i64: 256, 128>}, {transform_indices = @transform_3, window_bounds = array<i64: 256, 128>}]} {
    %c0 = arith.constant 0 : index
    %c0_0 = arith.constant 0 : index
    %0 = vector.load %arg3[%c0, %c0_0] : memref<256x128xf32, #tpu.memory_space<vmem>>, vector<256x128xf32>
    %c0_1 = arith.constant 0 : index
    %1 = memref.load %arg1[%c0_1] : memref<1xf32, #tpu.memory_space<smem>>
    %2 = vector.broadcast %1 : f32 to vector<256x128xf32>
    %3 = arith.mulf %0, %2 : vector<256x128xf32>
    %c0_2 = arith.constant 0 : index
    %4 = memref.load %arg2[%c0_2] : memref<1xf32, #tpu.memory_space<smem>>
    %5 = vector.broadcast %4 : f32 to vector<256x128xf32>
    %6 = arith.addf %3, %5 : vector<256x128xf32>
    %c0_3 = arith.constant 0 : index
    %c0_4 = arith.constant 0 : index
    %7 = vector.load %arg4[%c0_3, %c0_4] : memref<256x128xf32, #tpu.memory_space<vmem>>, vector<256x128xf32>
    tpu.vector_store %arg4[%c0_3, %c0_4], %6 {strides = array<i32>} : memref<256x128xf32, #tpu.memory_space<vmem>>, vector<256x128xf32>,
    return
  }
  func.func @transform_0(%arg0: i32) -> i32 {
    %c0_i32 = arith.constant 0 : i32
    %c0_i32_0 = arith.constant 0 : i32
    return %c0_i32 : i32
  }
  func.func @transform_1(%arg0: i32) -> i32 {
    %c0_i32 = arith.constant 0 : i32
    %c0_i32_0 = arith.constant 0 : i32
    return %c0_i32 : i32
  }
  func.func @transform_2(%arg0: i32) -> (i32, i32) {
    %c0_i32 = arith.constant 0 : i32
    %c0_i32_0 = arith.constant 0 : i32
    return %arg0, %c0_i32 : i32, i32
  }
  func.func @transform_3(%arg0: i32) -> (i32, i32) {
    %c0_i32 = arith.constant 0 : i32
    %c0_i32_0 = arith.constant 0 : i32
    return %arg0, %c0_i32 : i32, i32
  }
}

</mosaic_0001>

<bundles_post_ra>
// kernel: tpu_custom_call.1
= control target key start
LH: loop header
LB: loop body
LE: loop exit
PB: predicated region body
PF: predicated region fallthrough
CT: control target
= control target key end

     0   :  { %s876_s0 = inlined_call_operand.<no memory space> [shape: f32[1], index: 0, kind: input, shape index: {}]   ;;  %s877_s1 = inlined_call_operand.<no memory space> [shape: f32[1], index: 1, kind: input, shape index: {}]   ;;  %s878_s2 = inlined_call_operand.hbm [shape: f32[1024,128], index: 2, kind: input, shape index: {}]   ;;  %s879_s3 = inlined_call_operand.hbm [shape: f32[1024,128], index: 3, kind: output, shape index: {}]  }
   0x1   :  { %8 = sst [smem:[#allocation2]] %s876_s0 }
   0x2   :  { %9 = sst [smem:[#allocation3]] %s877_s1 }
   0x3   :  { %10 = vsyncpa [#allocation5], 0 }
   0x4   :  { %12 = vsyncpa [#allocation5 + $0x1], 0 }
   0x5   :  { %13 = vsyncpa [#allocation6], 0 }
   0x6   :  { %15 = vsyncpa [#allocation6 + $0x1], 0  ;;  %s610_s16 = smov 0   ;;  %s612_s17 = smov 0  }
   0x7   :  { %s614_s18 = smov 0   ;;  %s616_s19 = smov 0  }
   0x8 LB: > { %s631_s0 = sadd.s32 4294967295, %s578_s19   ;;  %s416_s1 = sadd.s32 4294967294, %s578_s19   ;;  %s578_s19 = sphi %s616_s19, %s888_s19   ;;  %s574_s18 = sphi %s614_s18, %s887_s18   ;;  %s570_s17 = sphi %s612_s17, %s886_s17   ;;  %s566_s16 = sphi %s610_s16, %s885_s16  }
   0x9   : > { %s635_s20 = sadd.s32 1, %s578_s19   ;;  %s70_s21 = sadd.s32 1, %s574_s18 }
   0xa   : > { %s67_s22 = ssub.s32 %s578_s19, %s635_s20  ;;  %p77_p0 = scmp.ne.s32.totalorder %s574_s18, %s570_s17 }
   0xb   : > { %p68_p1 = scmp.eq.s32.totalorder %s67_s22, 0  ;;  %p78_p2 = scmp.eq.s32.totalorder %s578_s19, 0 }
   0xc   : > { %p83_p3 = scmp.ne.s32.totalorder %s570_s17, %s566_s16  ;;  %p84_p4 = scmp.eq.s32.totalorder %s631_s0, 0 }
   0xd   : > { %s647_s23 = scalar_select %p68_p1, %s574_s18, %s70_s21  }
   0xe   : > { %p649_p5 = por %p78_p2, %p77_p0  ;;  %p653_p6 = por %p84_p4, %p83_p3 }
   0xf   : > { %p107_p7 = scmp.eq.s32.totalorder %s631_s0, 3  ;;  %p113_p8 = scmp.eq.s32.totalorder %s416_s1, 3 }
  0x10   : > { %p444_p9 = scmp.lt.s32.totalorder %s578_s19, 4  ;;  %s139_s28 = sand.u32 1, %s574_s18  }
  0x11   : > { %p659_p10 = por %p107_p7, %p77_p0  ;;  %p663_p11 = por %p113_p8, %p83_p3 }
  0x12   : > { %s430_s29 = sshll.u32 %s578_s19, 8  ;;  %s419_s30 = sshll.u32 %s139_s28, 8 }
  0x13   : > { %s148_s6 = scalar_lea.hbm %s878_s2, %s430_s29  ;;  %s143_s8 = scalar_lea.vmem [#allocation4], %s419_s30 }
  0x14   : > { %s149_s7 = sshll.u32 %s148_s6, 4  ;;  %s151_s9 = sshll.u32 %s143_s8, 4  ;;  %s150_s7 = int_to_ptr.hbm [resolvable:$true] %s149_s7  ;;  %s152_s9 = int_to_ptr.vmem [resolvable:$true] %s151_s9 }
  0x15   : > { %p674_p12 = pnand %p444_p9, %p649_p5  ;;  %p422_p13 = scmp.ge.s32.totalorder %s578_s19, 1 }
  0x16   : > { %p159_p0 = scmp.lt.s32.totalorder %s578_s19, 5  ;;  %s140_s11 = scalar_lea.sflag [#allocation5], %s139_s28 }
  0x17   : > { %s482_s12 = sshra.s32 %s150_s7, 4  ;;  %p486_p2 = pneg %p674_p12  ;;  %s483_s12 = int_to_ptr.hbm [resolvable:$true] %s482_s12 }
  0x18   : > { %s484_s13 = scalar_lea.hbm %s483_s12, 256  ;;  %s489_s1 = scalar_lea.hbm %s878_s2, 1024 }
  0x19   : > { %p485_p1 = scmp.ne.s32.totalorder %s483_s12, %s484_s13  ;;  %p490_p5 = scmp.lt.s32.totalorder %s483_s12, %s878_s2 }
  0x1a   : > { %p491_p7 = scmp.lt.s32.totalorder %s489_s1, %s484_s13 }
  0x1b   : > { %p487_p3 = pnand %p486_p2, %p485_p1 }
  0x1c   : > { %p492_p8 = por %p491_p7, %p490_p5 }
  0x1d   : > { %p488_p4 = pneg %p487_p3 }
  0x1f   : > { %p493_p9 = pnand %p492_p8, %p488_p4 }
  0x21   : > { %496 = shalt.err (!%p493_p9)
}
  0x22   : > { %s580_s24 = smov 128   ;;  %s581_s28 = smov 8  }
  0x23   : > { %439 = dma.hbm_to_vmem [thread:$0]  (!%p674_p12), %s150_s7, 4096, %s152_s9, %s140_s11, %s580_s24, %s580_s24, %s581_s28  }
  0x24   : > { %p160_p1 = pnand %p422_p13, %p159_p0 }
  0x25   : > { %s695_s29 = sand.u32 (!%p160_p1), 1, %s570_s17  }
  0x26   : > { %163 = sbr.rel (%p160_p1) target bundleno = 90 (0x5a), region = 32  ;;  %s423_s30 = sshll.u32 (!%p160_p1), %s695_s29, 8 }
  0x27   : > { %s166_s4 = scalar_lea.sflag (!%p160_p1), [#allocation5], %s695_s29  ;;  %s701_s5 = scalar_lea.vmem (!%p160_p1), [#allocation4], %s423_s30 }
  0x2b   : > { %557 = dma.done.wait (%p653_p6), %s166_s4, 4096  }
  0x2c   : > { %559 = vsyncadd (%p653_p6), %s166_s4, 4294963200  ;;  %s227_s6 = sld [smem:[#allocation2]]  ;;  %v195_v0 = vld [vmem:[%s701_s5] sm:$0xff]  ;;  %v196_v2 = vld [vmem:[%s701_s5 + $0x8] sm:$0xff]  ;;  %s736_s25 = scalar_lea.vmem [#allocation7], %s423_s30 }
  0x2d   : > { %s261_s7 = sld [smem:[#allocation3]]  ;;  %v197_v3 = vld [vmem:[%s701_s5 + $0x10] sm:$0xff]  ;;  %v198_v8 = vld [vmem:[%s701_s5 + $0x18] sm:$0xff]  ;;  %v199_v9 = vld [vmem:[%s701_s5 + $0x20] sm:$0xff]  ;;  %s431_s8 = sshll.u32 %s631_s0, 8 }
  0x2e   : > { %v200_v10 = vld [vmem:[%s701_s5 + $0x28] sm:$0xff]  ;;  %v201_v14 = vld [vmem:[%s701_s5 + $0x30] sm:$0xff]  ;;  %v202_v15 = vld [vmem:[%s701_s5 + $0x38] sm:$0xff]  ;;  %s339_s10 = scalar_lea.hbm %s879_s3, %s431_s8  ;;  %s340_s11 = sshll.u32 %s736_s25, 4  ;;  %s341_s11 = int_to_ptr.vmem [resolvable:$true] %s340_s11 }
  0x2f   : > { %v203_v16 = vld [vmem:[%s701_s5 + $0x40] sm:$0xff]  ;;  %v204_v21 = vld [vmem:[%s701_s5 + $0x48] sm:$0xff]  ;;  %v205_v24 = vld [vmem:[%s701_s5 + $0x50] sm:$0xff]  ;;  %s342_s12 = sshll.u32 %s339_s10, 4  ;;  %s328_s13 = scalar_lea.sflag [#allocation6], %s695_s29  ;;  %s343_s12 = int_to_ptr.hbm [resolvable:$true] %s342_s12 }
  0x30   : > { %v206_v27 = vld [vmem:[%s701_s5 + $0x58] sm:$0xff]  ;;  %v207_v30 = vld [vmem:[%s701_s5 + $0x60] sm:$0xff]  ;;  %v208_v33 = vld [vmem:[%s701_s5 + $0x68] sm:$0xff]  ;;  %s526_s14 = sshra.s32 %s343_s12, 4  ;;  %s532_s22 = scalar_lea.hbm %s879_s3, 1024  ;;  %s527_s14 = int_to_ptr.hbm [resolvable:$true] %s526_s14 }
  0x31   : > { %v209_v36 = vld [vmem:[%s701_s5 + $0x70] sm:$0xff]  ;;  %v210_v39 = vld [vmem:[%s701_s5 + $0x78] sm:$0xff]  ;;  %v211_v42 = vld [vmem:[%s701_s5 + $0x80] sm:$0xff]  ;;  %s528_s15 = scalar_lea.hbm %s527_s14, 256  ;;  %p533_p0 = scmp.lt.s32.totalorder %s527_s14, %s879_s3 }
  0x32   : > { %v708_v1 = vstv %s227_s6  ;;  %v212_v45 = vld [vmem:[%s701_s5 + $0x88] sm:$0xff]  ;;  %v213_v48 = vld [vmem:[%s701_s5 + $0x90] sm:$0xff]  ;;  %v214_v51 = vld [vmem:[%s701_s5 + $0x98] sm:$0xff]  ;;  %p529_p6 = scmp.ne.s32.totalorder %s527_s14, %s528_s15  ;;  %p534_p2 = scmp.lt.s32.totalorder %s532_s22, %s528_s15 }
  0x33   : > { %v229_v4 = vmul.f32 %v708_v1, %v195_v0  ;;  %v713_v5 = vstv %s261_s7  ;;  %v230_v6 = vmul.f32 %v708_v1, %v196_v2  ;;  %v231_v7 = vmul.f32 %v708_v1, %v197_v3  ;;  %v215_v54 = vld [vmem:[%s701_s5 + $0xa0] sm:$0xff]  ;;  %v216_v57 = vld [vmem:[%s701_s5 + $0xa8] sm:$0xff]  ;;  %v217_v60 = vld [vmem:[%s701_s5 + $0xb0] sm:$0xff] }
  0x34   : > { %v232_v11 = vmul.f32 %v708_v1, %v198_v8  ;;  %v233_v12 = vmul.f32 %v708_v1, %v199_v9  ;;  %v234_v13 = vmul.f32 %v708_v1, %v200_v10  ;;  %v235_v20 = vmul.f32 %v708_v1, %v201_v14  ;;  %v218_v63 = vld [vmem:[%s701_s5 + $0xb8] sm:$0xff]  ;;  %v219_v3 = vld [vmem:[%s701_s5 + $0xc0] sm:$0xff]  ;;  %v221_v10 = vld [vmem:[%s701_s5 + $0xd0] sm:$0xff]  ;;  %p530_p12 = pnand %p529_p6, %p659_p10  ;;  %p535_p3 = por %p534_p2, %p533_p0 }
  0x35   : > { %v263_v17 = vadd.f32 %v713_v5, %v229_v4  ;;  %v264_v18 = vadd.f32 %v713_v5, %v230_v6  ;;  %v265_v19 = vadd.f32 %v713_v5, %v231_v7  ;;  %v236_v23 = vmul.f32 %v708_v1, %v202_v15  ;;  %v220_v7 = vld [vmem:[%s701_s5 + $0xc8] sm:$0xff] }
  0x36   : > { %v266_v22 = vadd.f32 %v713_v5, %v232_v11  ;;  %v267_v25 = vadd.f32 %v713_v5, %v233_v12  ;;  %v237_v26 = vmul.f32 %v708_v1, %v203_v16  ;;  %v268_v28 = vadd.f32 %v713_v5, %v234_v13  ;;  %v222_v13 = vld [vmem:[%s701_s5 + $0xd8] sm:$0xff]  ;;  %v223_v16 = vld [vmem:[%s701_s5 + $0xe0] sm:$0xff]  ;;  %p531_p13 = pneg %p530_p12 }
  0x37   : > { %295 = vst [vmem:[%s736_s25] sm:$0xff] %v263_v17  ;;  %v238_v29 = vmul.f32 %v708_v1, %v204_v21  ;;  %v269_v31 = vadd.f32 %v713_v5, %v235_v20  ;;  %v239_v32 = vmul.f32 %v708_v1, %v205_v24  ;;  %v270_v34 = vadd.f32 %v713_v5, %v236_v23 }
  0x38   : > { %296 = vst [vmem:[%s736_s25 + $0x8] sm:$0xff] %v264_v18  ;;  %v240_v35 = vmul.f32 %v708_v1, %v206_v27  ;;  %v271_v37 = vadd.f32 %v713_v5, %v237_v26  ;;  %v241_v38 = vmul.f32 %v708_v1, %v207_v30  ;;  %v242_v41 = vmul.f32 %v708_v1, %v208_v33  ;;  %p536_p4 = pnand %p535_p3, %p531_p13 }
  0x39   : > { %297 = vst [vmem:[%s736_s25 + $0x10] sm:$0xff] %v265_v19  ;;  %v272_v40 = vadd.f32 %v713_v5, %v238_v29  ;;  %v273_v43 = vadd.f32 %v713_v5, %v239_v32  ;;  %v243_v44 = vmul.f32 %v708_v1, %v209_v36  ;;  %v244_v47 = vmul.f32 %v708_v1, %v210_v39  ;;  %v224_v19 = vld [vmem:[%s701_s5 + $0xe8] sm:$0xff] }
  0x3a   : > { %298 = vst [vmem:[%s736_s25 + $0x18] sm:$0xff] %v266_v22  ;;  %v274_v46 = vadd.f32 %v713_v5, %v240_v35  ;;  %v275_v49 = vadd.f32 %v713_v5, %v241_v38  ;;  %v245_v50 = vmul.f32 %v708_v1, %v211_v42  ;;  %v276_v52 = vadd.f32 %v713_v5, %v242_v41  ;;  %v225_v22 = vld [vmem:[%s701_s5 + $0xf0] sm:$0xff] }
  0x3b   : > { %299 = vst [vmem:[%s736_s25 + $0x20] sm:$0xff] %v267_v25  ;;  %v246_v53 = vmul.f32 %v708_v1, %v212_v45  ;;  %v277_v55 = vadd.f32 %v713_v5, %v243_v44  ;;  %v247_v56 = vmul.f32 %v708_v1, %v213_v48  ;;  %v278_v58 = vadd.f32 %v713_v5, %v244_v47  ;;  %v226_v25 = vld [vmem:[%s701_s5 + $0xf8] sm:$0xff] }
  0x3c   : > { %300 = vst [vmem:[%s736_s25 + $0x28] sm:$0xff] %v268_v28  ;;  %v248_v59 = vmul.f32 %v708_v1, %v214_v51  ;;  %v279_v61 = vadd.f32 %v713_v5, %v245_v50  ;;  %v249_v62 = vmul.f32 %v708_v1, %v215_v54  ;;  %v250_v2 = vmul.f32 %v708_v1, %v216_v57 }
  0x3d   : > { %301 = vst [vmem:[%s736_s25 + $0x30] sm:$0xff] %v269_v31  ;;  %v280_v0 = vadd.f32 %v713_v5, %v246_v53  ;;  %v281_v4 = vadd.f32 %v713_v5, %v247_v56  ;;  %v251_v6 = vmul.f32 %v708_v1, %v217_v60  ;;  %v252_v9 = vmul.f32 %v708_v1, %v218_v63 }
  0x3e   : > { %302 = vst [vmem:[%s736_s25 + $0x38] sm:$0xff] %v270_v34  ;;  %v282_v8 = vadd.f32 %v713_v5, %v248_v59  ;;  %v283_v11 = vadd.f32 %v713_v5, %v249_v62  ;;  %v253_v12 = vmul.f32 %v708_v1, %v219_v3  ;;  %v284_v14 = vadd.f32 %v713_v5, %v250_v2 }
  0x3f   : > { %303 = vst [vmem:[%s736_s25 + $0x40] sm:$0xff] %v271_v37  ;;  %v254_v15 = vmul.f32 %v708_v1, %v220_v7  ;;  %v285_v17 = vadd.f32 %v713_v5, %v251_v6  ;;  %v255_v18 = vmul.f32 %v708_v1, %v221_v10  ;;  %v286_v20 = vadd.f32 %v713_v5, %v252_v9 }
  0x40   : > { %304 = vst [vmem:[%s736_s25 + $0x48] sm:$0xff] %v272_v40  ;;  %v256_v21 = vmul.f32 %v708_v1, %v222_v13  ;;  %v287_v23 = vadd.f32 %v713_v5, %v253_v12  ;;  %v257_v24 = vmul.f32 %v708_v1, %v223_v16  ;;  %v258_v27 = vmul.f32 %v708_v1, %v224_v19 }
  0x41   : > { %305 = vst [vmem:[%s736_s25 + $0x50] sm:$0xff] %v273_v43  ;;  %v288_v26 = vadd.f32 %v713_v5, %v254_v15  ;;  %v289_v28 = vadd.f32 %v713_v5, %v255_v18  ;;  %v259_v29 = vmul.f32 %v708_v1, %v225_v22  ;;  %v260_v31 = vmul.f32 %v708_v1, %v226_v25 }
  0x42   : > { %306 = vst [vmem:[%s736_s25 + $0x58] sm:$0xff] %v274_v46  ;;  %v290_v30 = vadd.f32 %v713_v5, %v256_v21  ;;  %v291_v32 = vadd.f32 %v713_v5, %v257_v24  ;;  %v292_v33 = vadd.f32 %v713_v5, %v258_v27 }
  0x43   : > { %307 = vst [vmem:[%s736_s25 + $0x60] sm:$0xff] %v275_v49  ;;  %v293_v34 = vadd.f32 %v713_v5, %v259_v29  ;;  %v294_v35 = vadd.f32 %v713_v5, %v260_v31 }
  0x44   : > { %308 = vst [vmem:[%s736_s25 + $0x68] sm:$0xff] %v276_v52 }
  0x45   : > { %309 = vst [vmem:[%s736_s25 + $0x70] sm:$0xff] %v277_v55 }
  0x46   : > { %310 = vst [vmem:[%s736_s25 + $0x78] sm:$0xff] %v278_v58 }
  0x47   : > { %311 = vst [vmem:[%s736_s25 + $0x80] sm:$0xff] %v279_v61 }
  0x48   : > { %312 = vst [vmem:[%s736_s25 + $0x88] sm:$0xff] %v280_v0 }
  0x49   : > { %313 = vst [vmem:[%s736_s25 + $0x90] sm:$0xff] %v281_v4 }
  0x4a   : > { %314 = vst [vmem:[%s736_s25 + $0x98] sm:$0xff] %v282_v8 }
  0x4b   : > { %315 = vst [vmem:[%s736_s25 + $0xa0] sm:$0xff] %v283_v11 }
  0x4c   : > { %316 = vst [vmem:[%s736_s25 + $0xa8] sm:$0xff] %v284_v14 }
  0x4d   : > { %317 = vst [vmem:[%s736_s25 + $0xb0] sm:$0xff] %v285_v17 }
  0x4e   : > { %318 = vst [vmem:[%s736_s25 + $0xb8] sm:$0xff] %v286_v20 }
  0x4f   : > { %319 = vst [vmem:[%s736_s25 + $0xc0] sm:$0xff] %v287_v23 }
  0x50   : > { %320 = vst [vmem:[%s736_s25 + $0xc8] sm:$0xff] %v288_v26 }
  0x51   : > { %321 = vst [vmem:[%s736_s25 + $0xd0] sm:$0xff] %v289_v28 }
  0x52   : > { %322 = vst [vmem:[%s736_s25 + $0xd8] sm:$0xff] %v290_v30 }
  0x53   : > { %323 = vst [vmem:[%s736_s25 + $0xe0] sm:$0xff] %v291_v32 }
  0x54   : > { %324 = vst [vmem:[%s736_s25 + $0xe8] sm:$0xff] %v292_v33 }
  0x55   : > { %325 = vst [vmem:[%s736_s25 + $0xf0] sm:$0xff] %v293_v34 }
  0x56   : > { %326 = vst [vmem:[%s736_s25 + $0xf8] sm:$0xff] %v294_v35 }
  0x57   : > { %539 = shalt.err (!%p536_p4)
}
  0x58   : > { %s582_s29 = smov 128   ;;  %s583_s30 = smov 8  }
  0x59   : > { %434 = dma.vmem_to_hbm [thread:$0]  (%p659_p10), %s341_s11, 4096, %s343_s12, %s328_s13, %s582_s29, %s582_s29, %s583_s30  }
  0x5a PF: > { %p445_p5 = scmp.ge.s32.totalorder %s578_s19, 2  ;;  %s357_s4 = sand.u32 1, %s566_s16  }
  0x5b   : > { %s358_s5 = scalar_lea.sflag [#allocation6], %s357_s4 }
  0x5c   : > { %p441_p7 = pnand %p445_p5, %p663_p11 }
  0x5e   : > { %p442_p8 = pneg %p441_p7 }
  0x60   : > { %561 = dma.done.wait (%p442_p8), %s358_s5, 4096  }
  0x61   : > { %563 = vsyncadd (%p442_p8), %s358_s5, 4294963200  ;;  %p18_p9 = scmp.ge.s32.totalorder %s635_s20, 6   ;;  %s885_s16 = smov %s570_s17 }
  0x62   : > { %s886_s17 = smov %s574_s18  ;;  %s887_s18 = smov %s647_s23 }
  0x63   : > { %s888_s19 = smov %s635_s20  ;;  %20 = sbr.rel (!%p18_p9) target bundleno = 8 (0x8), region = 77 }
  0x68   :  { %364 = vsyncpa [#allocation5], 1 }
  0x69   :  { %366 = vsyncpa [#allocation5 + $0x1], 1 }
  0x6a   :  { %367 = vsyncpa [#allocation6], 1 }
  0x6b   :  { %369 = vsyncpa [#allocation6 + $0x1], 1 }

</bundles_post_ra>
